<compile_context>
chip_gen: v5e
topology: v5e:2x2
jax: 0.10.0
libtpu: 0.0.40
codegen_flags: <defaults>
</compile_context>

<pallas_src>
import jax
import jax.numpy as jnp
from jax import lax
from jax.experimental import pallas as pl
from jax.experimental.pallas import tpu as pltpu


def _round_up(v, m):
    return ((v + m - 1) // m) * m


def _conv_mm_kernel(p_ref, w_ref, b_ref, o_ref):
    # p_ref: (TM, Kp) patches tile; w_ref: (Kp, Np) VMEM-resident weight;
    # b_ref: (1, Np) VMEM-resident bias; o_ref: (TM, Np) lane-dense output.
    acc = jnp.dot(p_ref[...], w_ref[...], preferred_element_type=jnp.float32)
    acc = acc + b_ref[...]
    o_ref[...] = jnp.maximum(acc, 0.0).astype(o_ref.dtype)


def conv_layer_forward(x, weight, bias, *, tm=512, use_bf16_inputs=False):
    """Forward pass of ConvLayer: Conv2d(stride=1, no padding) + ReLU.

    x:      (B, Cin, H, W)    float32
    weight: (Cout, Cin, K, K) float32
    bias:   (Cout,)           float32
    returns (B, Cout, OH, OW) float32 with OH = H-K+1, OW = W-K+1
    """
    B, Cin, H, W = x.shape
    Cout, _, K, _ = weight.shape
    OH, OW = H - K + 1, W - K + 1
    Kdim = Cin * K * K
    M = B * OH * OW

    # --- transpose-free im2col (XLA glue) --------------------------------
    # Column order (c, ky, kx) matches weight.reshape(Cout, Cin*K*K).
    cols = []
    for c in range(Cin):
        for ky in range(K):
            for kx in range(K):
                cols.append(x[:, c, ky:ky + OH, kx:kx + OW])  # (B, OH, OW)
    patches = jnp.stack(cols, axis=-1)                        # (B, OH, OW, Kdim)
    patches = patches.reshape(M, Kdim)                        # (M, Kdim)

    w_mat = weight.reshape(Cout, Kdim).T                      # (Kdim, Cout), tiny
    b_mat = bias.reshape(1, Cout)                             # (1, Cout)

    # --- pad to TPU-friendly shapes ---------------------------------------
    # Contraction dim -> multiple of 128 (aligned MXU feed); N -> Cout rounded
    # to 128 so the whole weight is a single resident block and the output
    # last dim is a multiple of 128 (unmasked stores).
    Kp = _round_up(Kdim, 128)
    Np = _round_up(Cout, 128)
    patches = jnp.pad(patches, ((0, 0), (0, Kp - Kdim)))
    w_mat = jnp.pad(w_mat, ((0, Kp - Kdim), (0, Np - Cout)))
    b_mat = jnp.pad(b_mat, ((0, 0), (0, Np - Cout)))

    if use_bf16_inputs:
        # bf16 operands, f32 accumulation: MXU peak rate + half the patch DMA.
        patches = patches.astype(jnp.bfloat16)
        w_mat = w_mat.astype(jnp.bfloat16)

    # --- M tiling ----------------------------------------------------------
    # Large tiles amortize the ~0.35 us per-grid-step overhead; the cap keeps
    # >= 2 grid steps on small problems (megacore / v7x 2-TC sharding).
    # Multiple of 16 keeps bf16 sublane packing clean (and f32's 8 | 16).
    tm_eff = min(tm, _round_up(max(M // 2, 16), 16))
    Mp = _round_up(M, tm_eff)
    if Mp != M:
        patches = jnp.pad(patches, ((0, Mp - M), (0, 0)))

    grid = (Mp // tm_eff,)

    bytes_accessed = (patches.size * patches.dtype.itemsize
                      + w_mat.size * w_mat.dtype.itemsize
                      + b_mat.size * b_mat.dtype.itemsize
                      + Mp * Np * 4)
    cost = pl.CostEstimate(flops=2 * M * Kdim * Cout,
                           transcendentals=0,
                           bytes_accessed=bytes_accessed)

    # VMEM note: double-buffered patches (2*tm*Kp) + output (2*tm*Np*4B) +
    # resident weight/bias is well under the 32 MiB scoped default even on
    # v7x for tm<=2048, so no vmem_limit_bytes override is needed here.
    out_flat = pl.pallas_call(
        _conv_mm_kernel,
        out_shape=jax.ShapeDtypeStruct((Mp, Np), jnp.float32),
        grid_spec=pltpu.PrefetchScalarGridSpec(
            num_scalar_prefetch=0,
            grid=grid,
            in_specs=[
                pl.BlockSpec((tm_eff, Kp), lambda i: (i, 0)),
                pl.BlockSpec((Kp, Np), lambda i: (0, 0)),   # weight: resident
                pl.BlockSpec((1, Np), lambda i: (0, 0)),    # bias:   resident
            ],
            out_specs=pl.BlockSpec((tm_eff, Np), lambda i: (i, 0)),
        ),
        compiler_params=pltpu.CompilerParams(
            dimension_semantics=("parallel",)),
        cost_estimate=cost,
    )(patches, w_mat, b_mat)

    out = out_flat[:M, :Cout]                                 # (B*OH*OW, Cout)
    out = out.reshape(B, OH, OW, Cout)                        # NHWC
    # NCHW to match the PyTorch module; downstream consumers that accept NHWC
    # can skip this transpose entirely.
    return out.transpose(0, 3, 1, 2)


def _reference_conv(x, weight, bias):
    y = lax.conv_general_dilated(
        x, weight, window_strides=(1, 1), padding="VALID",
        dimension_numbers=("NCHW", "OIHW", "NCHW"))
    y = y + bias.reshape(1, -1, 1, 1)
    return jnp.maximum(y, 0.0)


if __name__ == "__main__":
    # Module defaults: in_channels=1, out_channels=256, kernel_size=9.
    B, Cin, H, W = 2, 1, 16, 16
    Cout, K = 256, 9

    key = jax.random.PRNGKey(0)
    kx, kw, kb = jax.random.split(key, 3)

    x = jax.random.normal(kx, (B, Cin, H, W), dtype=jnp.float32)
    # Deterministic init mimicking PyTorch's uniform(-1/sqrt(fan_in), +1/sqrt(fan_in)).
    fan_in = Cin * K * K
    bound = 1.0 / jnp.sqrt(jnp.float32(fan_in))
    weight = jax.random.uniform(kw, (Cout, Cin, K, K), jnp.float32, -bound, bound)
    bias = jax.random.uniform(kb, (Cout,), jnp.float32, -bound, bound)

    ref = _reference_conv(x, weight, bias)

    # fp32 operands: tight tolerance against the XLA conv reference.
    fwd = jax.jit(conv_layer_forward)
    out = jax.block_until_ready(fwd(x, weight, bias))
    assert out.shape == (B, Cout, H - K + 1, W - K + 1)
    assert jnp.allclose(out, ref, atol=1e-4, rtol=1e-4)

    # bf16 operands (f32 accumulation): looser tolerance, as flagged in review.
    fwd_bf16 = jax.jit(lambda a, w, b: conv_layer_forward(a, w, b,
                                                          use_bf16_inputs=True))
    out_bf16 = jax.block_until_ready(fwd_bf16(x, weight, bias))
    assert out_bf16.shape == out.shape
    assert jnp.allclose(out_bf16, ref, atol=5e-2, rtol=5e-2)

    print("KERNEL_OK")
</pallas_src>

<mosaic_0001>
module attributes {stable_mosaic.version = 11 : i64} {
  func.func @_conv_mm_kernel(%arg0: i32, %arg1: memref<64x128xf32, #tpu.memory_space<vmem>>, %arg2: memref<128x256xf32, #tpu.memory_space<vmem>>, %arg3: memref<1x256xf32, #tpu.memory_space<vmem>>, %arg4: memref<64x256xf32, #tpu.memory_space<vmem>>) attributes {dimension_semantics = [#tpu.dimension_semantics<parallel>], iteration_bounds = array<i64: 2>, scalar_prefetch = 0 : i64, scratch_operands = 0 : i64, tpu.core_type = #tpu.core_type<tc>, window_params = [{transform_indices = @transform_0, window_bounds = array<i64: 64, 128>}, {pipeline_mode = #tpu.pipeline_mode<synchronous>, transform_indices = @transform_1, window_bounds = array<i64: 128, 256>}, {pipeline_mode = #tpu.pipeline_mode<synchronous>, transform_indices = @transform_2, window_bounds = array<i64: 1, 256>}, {transform_indices = @transform_3, window_bounds = array<i64: 64, 256>}]} {
    %c0 = arith.constant 0 : index
    %c0_0 = arith.constant 0 : index
    %0 = vector.load %arg1[%c0, %c0_0] : memref<64x128xf32, #tpu.memory_space<vmem>>, vector<64x128xf32>
    %c0_1 = arith.constant 0 : index
    %c0_2 = arith.constant 0 : index
    %1 = vector.load %arg2[%c0_1, %c0_2] : memref<128x256xf32, #tpu.memory_space<vmem>>, vector<128x256xf32>
    %cst = arith.constant dense<0.000000e+00> : vector<64x256xf32>
    %2 = tpu.matmul %0, %1, %cst {dimension_numbers = #tpu.dot_dimension_numbers<[1], [0], [0], [1], [0, 0, 1, 1], [], []>} : vector<64x128xf32>, vector<128x256xf32>, vector<64x256xf32> -> vector<64x256xf32>
    %c0_3 = arith.constant 0 : index
    %c0_4 = arith.constant 0 : index
    %3 = vector.load %arg3[%c0_3, %c0_4] : memref<1x256xf32, #tpu.memory_space<vmem>>, vector<1x256xf32>
    %4 = vector.broadcast %3 : vector<1x256xf32> to vector<64x256xf32>
    %5 = arith.addf %2, %4 : vector<64x256xf32>
    %cst_5 = arith.constant 0.000000e+00 : f32
    %6 = vector.broadcast %cst_5 : f32 to vector<64x256xf32>
    %7 = arith.maximumf %5, %6 : vector<64x256xf32>
    %c0_6 = arith.constant 0 : index
    %c0_7 = arith.constant 0 : index
    %8 = vector.load %arg4[%c0_6, %c0_7] : memref<64x256xf32, #tpu.memory_space<vmem>>, vector<64x256xf32>
    tpu.vector_store %arg4[%c0_6, %c0_7], %7 {strides = array<i32>} : memref<64x256xf32, #tpu.memory_space<vmem>>, vector<64x256xf32>,
    return
  }
  func.func @transform_0(%arg0: i32) -> (i32, i32) {
    %c0_i32 = arith.constant 0 : i32
    %c0_i32_0 = arith.constant 0 : i32
    return %arg0, %c0_i32 : i32, i32
  }
  func.func @transform_1(%arg0: i32) -> (i32, i32) {
    %c0_i32 = arith.constant 0 : i32
    %c0_i32_0 = arith.constant 0 : i32
    %c0_i32_1 = arith.constant 0 : i32
    return %c0_i32, %c0_i32_0 : i32, i32
  }
  func.func @transform_2(%arg0: i32) -> (i32, i32) {
    %c0_i32 = arith.constant 0 : i32
    %c0_i32_0 = arith.constant 0 : i32
    %c0_i32_1 = arith.constant 0 : i32
    return %c0_i32, %c0_i32_0 : i32, i32
  }
  func.func @transform_3(%arg0: i32) -> (i32, i32) {
    %c0_i32 = arith.constant 0 : i32
    %c0_i32_0 = arith.constant 0 : i32
    return %arg0, %c0_i32 : i32, i32
  }
}

</mosaic_0001>

<bundles_post_ra>
// kernel: conv_layer_forward.1
= control target key start
LH: loop header
LB: loop body
LE: loop exit
PB: predicated region body
PF: predicated region fallthrough
CT: control target
= control target key end

     0   :  { %8 = vsyncpa [#allocation3], 0  ;;  %s821_s0 = inlined_call_operand.vmem [shape: f32[128,128], index: 0, kind: input, shape index: {}]   ;;  %s822_s1 = inlined_call_operand.vmem [shape: f32[128,256], index: 1, kind: input, shape index: {}]   ;;  %s823_s2 = inlined_call_operand.vmem [shape: f32[1,256], index: 2, kind: input, shape index: {}]   ;;  %s824_s3 = inlined_call_operand.hbm [shape: f32[128,256], index: 3, kind: output, shape index: {}]  }
   0x1   :  { %10 = vsyncpa [#allocation3 + $0x1], 0  ;;  %s585_s12 = smov 0   ;;  %s587_s13 = smov 0  }
   0x2   :  { %s589_s14 = smov 0   ;;  %s591_s15 = smov 0  }
   0x3 LB: > { %s606_s16 = sadd.s32 4294967295, %s561_s15   ;;  %s411_s17 = sadd.s32 4294967294, %s561_s15   ;;  %s561_s15 = sphi %s591_s15, %s830_s15   ;;  %s557_s14 = sphi %s589_s14, %s829_s14   ;;  %s553_s13 = sphi %s587_s13, %s828_s13   ;;  %s549_s12 = sphi %s585_s12, %s827_s12  }
   0x4   : > { %s610_s18 = sadd.s32 1, %s561_s15   ;;  %s91_s19 = sadd.s32 1, %s557_s14 }
   0x5   : > { %s88_s20 = ssub.s32 %s561_s15, %s610_s18  ;;  %p101_p0 = scmp.ne.s32.totalorder %s557_s14, %s553_s13 }
   0x6   : > { %p89_p1 = scmp.eq.s32.totalorder %s88_s20, 0  ;;  %p102_p2 = scmp.eq.s32.totalorder %s606_s16, 1 }
   0x7   : > { %p107_p3 = scmp.ne.s32.totalorder %s553_s13, %s549_s12  ;;  %p108_p4 = scmp.eq.s32.totalorder %s411_s17, 1 }
   0x8   : > { %s621_s21 = scalar_select %p89_p1, %s557_s14, %s91_s19  }
   0x9   : > { %p623_p5 = por %p102_p2, %p101_p0  ;;  %p627_p6 = por %p108_p4, %p107_p3 }
   0xa   : > { %p414_p7 = scmp.ge.s32.totalorder %s561_s15, 1  ;;  %p141_p8 = scmp.lt.s32.totalorder %s561_s15, 3 }
   0xc   : > { %p142_p9 = pnand %p414_p7, %p141_p8 }
   0xd   : > { %s416_s11 = sshll.u32 (!%p142_p9), %s606_s16, 3  ;;  %s425_s27 = sshll.u32 (!%p142_p9), %s606_s16, 7 }
   0xe   : > { %145 = sbr.rel (%p142_p9) target bundleno = 216 (0xd8), region = 32  ;;  %p166_p10 = scmp.lt.s32.totalorder (!%p142_p9), %s416_s11, 15 }
   0xf   : > { %s345_s30 = scalar_lea.hbm (!%p142_p9), %s824_s3, %s425_s27  ;;  %s519_s9 = scalar_lea.hbm (!%p142_p9), %s824_s3, 256 }
  0x10   : > { %s348_s4 = sshll.u32 (!%p142_p9), %s345_s30, 4  ;;  %s349_s4 = int_to_ptr.hbm [resolvable:$true] %s348_s4 }
  0x13   : > { %v210_v0 = vld [vmem:[%s822_s1 + $0xf0] sm:$0xff]  ;;  %v211_v1 = vld [vmem:[%s822_s1 + $0xf8] sm:$0xff]  ;;  %v208_v2 = vld [vmem:[%s822_s1 + $0xe0] sm:$0xff]  ;;  %s832_s11 = smov (!%p166_p10, %s416_s11), 15 }
  0x14   : > { %426 = vmatpush.msra.mxu2 %v210_v0  ;;  %442 = vmatpush.msra.mxu3 %v211_v1  ;;  %v209_v3 = vld [vmem:[%s822_s1 + $0xe8] sm:$0xff]  ;;  %v206_v4 = vld [vmem:[%s822_s1 + $0xd0] sm:$0xff]  ;;  %v207_v5 = vld [vmem:[%s822_s1 + $0xd8] sm:$0xff]  ;;  %s417_s24 = sshll.u32 %s832_s11, 3  ;;  %s513_s11 = sshra.s32 %s349_s4, 4  ;;  %s514_s11 = int_to_ptr.hbm [resolvable:$true] %s513_s11 }
  0x15   : > { %218 = vmatpush.msra.mxu0 %v210_v0  ;;  %259 = vmatpush.msra.mxu1 %v211_v1  ;;  %v204_v6 = vld [vmem:[%s822_s1 + $0xc0] sm:$0xff]  ;;  %v205_v7 = vld [vmem:[%s822_s1 + $0xc8] sm:$0xff]  ;;  %v202_v8 = vld [vmem:[%s822_s1 + $0xb0] sm:$0xff]  ;;  %s727_s7 = scalar_lea.vmem %s821_s0, %s417_s24  ;;  %s162_s24 = sand.u32 1, %s553_s13  }
  0x16   : > { %427 = vmatpush.msra.mxu2 %v208_v2  ;;  %443 = vmatpush.msra.mxu3 %v209_v3  ;;  %v203_v9 = vld [vmem:[%s822_s1 + $0xb8] sm:$0xff]  ;;  %v200_v10 = vld [vmem:[%s822_s1 + $0xa0] sm:$0xff]  ;;  %v201_v11 = vld [vmem:[%s822_s1 + $0xa8] sm:$0xff]  ;;  %s415_s25 = sshll.u32 %s162_s24, 7  ;;  %s333_s5 = scalar_lea.sflag [#allocation3], %s162_s24 }
  0x17   : > { %219 = vmatpush.msra.mxu0 %v208_v2  ;;  %260 = vmatpush.msra.mxu1 %v209_v3  ;;  %v198_v12 = vld [vmem:[%s822_s1 + $0x90] sm:$0xff]  ;;  %v199_v13 = vld [vmem:[%s822_s1 + $0x98] sm:$0xff]  ;;  %v196_v14 = vld [vmem:[%s822_s1 + $0x80] sm:$0xff]  ;;  %s755_s26 = scalar_lea.vmem [#allocation2], %s415_s25  ;;  %s515_s6 = scalar_lea.hbm %s514_s11, 128 }
  0x18   : > { %428 = vmatpush.msra.mxu2 %v206_v4  ;;  %444 = vmatpush.msra.mxu3 %v207_v5  ;;  %v197_v15 = vld [vmem:[%s822_s1 + $0x88] sm:$0xff]  ;;  %v194_v16 = vld [vmem:[%s822_s1 + $0x70] sm:$0xff]  ;;  %v195_v17 = vld [vmem:[%s822_s1 + $0x78] sm:$0xff]  ;;  %s346_s16 = sshll.u32 %s755_s26, 4  ;;  %p516_p11 = scmp.ne.s32.totalorder %s514_s11, %s515_s6  ;;  %s347_s16 = int_to_ptr.vmem [resolvable:$true] %s346_s16 }
  0x19   : > { %220 = vmatpush.msra.mxu0 %v206_v4  ;;  %261 = vmatpush.msra.mxu1 %v207_v5  ;;  %v192_v18 = vld [vmem:[%s822_s1 + $0x60] sm:$0xff]  ;;  %v193_v19 = vld [vmem:[%s822_s1 + $0x68] sm:$0xff]  ;;  %v190_v20 = vld [vmem:[%s822_s1 + $0x50] sm:$0xff]  ;;  %p520_p0 = scmp.lt.s32.totalorder %s514_s11, %s824_s3  ;;  %p521_p1 = scmp.lt.s32.totalorder %s519_s9, %s515_s6 }
  0x1a   : > { %429 = vmatpush.msra.mxu2 %v204_v6  ;;  %445 = vmatpush.msra.mxu3 %v205_v7  ;;  %v191_v21 = vld [vmem:[%s822_s1 + $0x58] sm:$0xff]  ;;  %v188_v22 = vld [vmem:[%s822_s1 + $0x40] sm:$0xff]  ;;  %v189_v23 = vld [vmem:[%s822_s1 + $0x48] sm:$0xff]  ;;  %p517_p12 = pnand %p516_p11, %p623_p5 }
  0x1b   : > { %221 = vmatpush.msra.mxu0 %v204_v6  ;;  %262 = vmatpush.msra.mxu1 %v205_v7  ;;  %v186_v24 = vld [vmem:[%s822_s1 + $0x30] sm:$0xff]  ;;  %v187_v25 = vld [vmem:[%s822_s1 + $0x38] sm:$0xff]  ;;  %v184_v26 = vld [vmem:[%s822_s1 + $0x20] sm:$0xff]  ;;  %p522_p2 = por %p521_p1, %p520_p0 }
  0x1c   : > { %430 = vmatpush.msra.mxu2 %v202_v8  ;;  %446 = vmatpush.msra.mxu3 %v203_v9  ;;  %v185_v27 = vld [vmem:[%s822_s1 + $0x28] sm:$0xff]  ;;  %v182_v28 = vld [vmem:[%s822_s1 + $0x10] sm:$0xff]  ;;  %v183_v29 = vld [vmem:[%s822_s1 + $0x18] sm:$0xff]  ;;  %p518_p13 = pneg %p517_p12 }
  0x1d   : > { %222 = vmatpush.msra.mxu0 %v202_v8  ;;  %263 = vmatpush.msra.mxu1 %v203_v9  ;;  %v180_v30 = vld [vmem:[%s822_s1] sm:$0xff]  ;;  %v181_v31 = vld [vmem:[%s822_s1 + $0x8] sm:$0xff]  ;;  %v178_v36 = vld [vmem:[%s727_s7 + $0x30] sm:$0xff] }
  0x1e   : > { %431 = vmatpush.msra.mxu2 %v200_v10  ;;  %447 = vmatpush.msra.mxu3 %v201_v11  ;;  %v176_v32 = vld [vmem:[%s727_s7 + $0x20] sm:$0xff]  ;;  %v177_v34 = vld [vmem:[%s727_s7 + $0x28] sm:$0xff]  ;;  %v174_v37 = vld [vmem:[%s727_s7 + $0x10] sm:$0xff]  ;;  %p523_p3 = pnand %p522_p2, %p518_p13 }
  0x1f   : > { %223 = vmatpush.msra.mxu0 %v200_v10  ;;  %264 = vmatpush.msra.mxu1 %v201_v11  ;;  %v172_v33 = vld [vmem:[%s727_s7] sm:$0xff]  ;;  %v173_v35 = vld [vmem:[%s727_s7 + $0x8] sm:$0xff]  ;;  %v179_v38 = vld [vmem:[%s727_s7 + $0x38] sm:$0xff] }
  0x20   : > { %432 = vmatpush.msra.mxu2 %v198_v12  ;;  %448 = vmatpush.msra.mxu3 %v199_v13  ;;  %v175_v39 = vld [vmem:[%s727_s7 + $0x18] sm:$0xff]  ;;  %v212_v40 = vld [vmem:[%s823_s2] sm:$0x3] }
  0x21   : > { %224 = vmatpush.msra.mxu0 %v198_v12  ;;  %265 = vmatpush.msra.mxu1 %v199_v13  ;;  %v747_v41 = vperm.slane %v212_v40, 0  ;;  %v749_v42 = vperm.slane %v212_v40, 1 }
  0x22   : > { %433 = vmatpush.msra.mxu2 %v196_v14  ;;  %449 = vmatpush.msra.mxu3 %v197_v15 }
  0x23   : > { %225 = vmatpush.msra.mxu0 %v196_v14  ;;  %266 = vmatpush.msra.mxu1 %v197_v15 }
  0x24   : > { %434 = vmatpush.msra.mxu2 %v194_v16  ;;  %450 = vmatpush.msra.mxu3 %v195_v17 }
  0x25   : > { %226 = vmatpush.msra.mxu0 %v194_v16  ;;  %267 = vmatpush.msra.mxu1 %v195_v17 }
  0x26   : > { %435 = vmatpush.msra.mxu2 %v192_v18  ;;  %451 = vmatpush.msra.mxu3 %v193_v19 }
  0x27   : > { %227 = vmatpush.msra.mxu0 %v192_v18  ;;  %268 = vmatpush.msra.mxu1 %v193_v19 }
  0x28   : > { %436 = vmatpush.msra.mxu2 %v190_v20  ;;  %452 = vmatpush.msra.mxu3 %v191_v21 }
  0x29   : > { %228 = vmatpush.msra.mxu0 %v190_v20  ;;  %269 = vmatpush.msra.mxu1 %v191_v21 }
  0x2a   : > { %437 = vmatpush.msra.mxu2 %v188_v22  ;;  %453 = vmatpush.msra.mxu3 %v189_v23 }
  0x2b   : > { %229 = vmatpush.msra.mxu0 %v188_v22  ;;  %270 = vmatpush.msra.mxu1 %v189_v23 }
  0x2c   : > { %438 = vmatpush.msra.mxu2 %v186_v24  ;;  %454 = vmatpush.msra.mxu3 %v187_v25 }
  0x2d   : > { %230 = vmatpush.msra.mxu0 %v186_v24  ;;  %271 = vmatpush.msra.mxu1 %v187_v25 }
  0x2e   : > { %439 = vmatpush.msra.mxu2 %v184_v26  ;;  %455 = vmatpush.msra.mxu3 %v185_v27 }
  0x2f   : > { %231 = vmatpush.msra.mxu0 %v184_v26  ;;  %272 = vmatpush.msra.mxu1 %v185_v27 }
  0x30   : > { %440 = vmatpush.msra.mxu2 %v182_v28  ;;  %456 = vmatpush.msra.mxu3 %v183_v29 }
  0x31   : > { %232 = vmatpush.msra.mxu0 %v182_v28  ;;  %273 = vmatpush.msra.mxu1 %v183_v29 }
  0x32   : > { %441 = vmatpush.msra.mxu2 %v180_v30  ;;  %457 = vmatpush.msra.mxu3 %v181_v31 }
  0x33   : > { %246 = vmatmul.f32.vlgmr.msra.gmra.mxu2 %v176_v32  ;;  %287 = vmatmul.f32.vlgmr.msra.gmra.mxu3 %v176_v32 }
  0x34   : > { %233 = vmatpush.msra.mxu0 %v180_v30  ;;  %274 = vmatpush.msra.mxu1 %v181_v31 }
  0x35   : > { %234 = vmatmul.f32.vlgmr.msra.gmra.mxu0 %v172_v33  ;;  %275 = vmatmul.f32.vlgmr.msra.gmra.mxu1 %v172_v33 }
  0x3b   : > { %249 = vmatmul.f32.gmra.mxu2 %v177_v34  ;;  %290 = vmatmul.f32.gmra.mxu3 %v177_v34 }
  0x3d   : > { %237 = vmatmul.f32.gmra.mxu0 %v173_v35  ;;  %278 = vmatmul.f32.gmra.mxu1 %v173_v35 }
  0x43   : > { %252 = vmatmul.f32.gmra.mxu2 %v178_v36  ;;  %293 = vmatmul.f32.gmra.mxu3 %v178_v36 }
  0x45   : > { %240 = vmatmul.f32.gmra.mxu0 %v174_v37  ;;  %281 = vmatmul.f32.gmra.mxu1 %v174_v37 }
  0x4b   : > { %255 = vmatmul.f32.gmra.mxu2 %v179_v38  ;;  %296 = vmatmul.f32.gmra.mxu3 %v179_v38 }
  0x4d   : > { %243 = vmatmul.f32.gmra.mxu0 %v175_v39  ;;  %284 = vmatmul.f32.gmra.mxu1 %v175_v39 }
  0xb2   : > { %v235_v43 = vpop.f32.mrf.mxu0  ;;  %v276_v44 = vpop.f32.mrf.mxu1 }
  0xb3   : > { %v236_v45 = vadd.f32 %v235_v43, %v747_v41  ;;  %v277_v46 = vadd.f32 %v276_v44, %v749_v42 }
  0xb5   : > { %v300_v47 = vmax.f32 %v236_v45, 0.0  ;;  %v301_v48 = vmax.f32 %v277_v46, 0.0 }
  0xb6   : > { %v247_v49 = vpop.f32.mrf.mxu2  ;;  %v288_v50 = vpop.f32.mrf.mxu3 }
  0xb7   : > { %316 = vst [vmem:[%s755_s26] sm:$0xff] %v300_v47  ;;  %v248_v51 = vadd.f32 %v247_v49, %v747_v41  ;;  %v289_v52 = vadd.f32 %v288_v50, %v749_v42 }
  0xb8   : > { %317 = vst [vmem:[%s755_s26 + $0x8] sm:$0xff] %v301_v48 }
  0xb9   : > { %v308_v53 = vmax.f32 %v248_v51, 0.0  ;;  %v309_v54 = vmax.f32 %v289_v52, 0.0 }
  0xba   : > { %v238_v55 = vpop.f32.mrf.mxu0  ;;  %v279_v56 = vpop.f32.mrf.mxu1 }
  0xbb   : > { %324 = vst [vmem:[%s755_s26 + $0x40] sm:$0xff] %v308_v53  ;;  %v239_v57 = vadd.f32 %v238_v55, %v747_v41  ;;  %v280_v58 = vadd.f32 %v279_v56, %v749_v42 }
  0xbc   : > { %325 = vst [vmem:[%s755_s26 + $0x48] sm:$0xff] %v309_v54 }
  0xbd   : > { %v302_v59 = vmax.f32 %v239_v57, 0.0  ;;  %v303_v60 = vmax.f32 %v280_v58, 0.0 }
  0xbe   : > { %v250_v61 = vpop.f32.mrf.mxu2  ;;  %v291_v62 = vpop.f32.mrf.mxu3 }
  0xbf   : > { %318 = vst [vmem:[%s755_s26 + $0x10] sm:$0xff] %v302_v59  ;;  %v251_v63 = vadd.f32 %v250_v61, %v747_v41  ;;  %v292_v0 = vadd.f32 %v291_v62, %v749_v42 }
  0xc0   : > { %319 = vst [vmem:[%s755_s26 + $0x18] sm:$0xff] %v303_v60 }
  0xc1   : > { %v310_v1 = vmax.f32 %v251_v63, 0.0  ;;  %v311_v2 = vmax.f32 %v292_v0, 0.0 }
  0xc2   : > { %v241_v3 = vpop.f32.mrf.mxu0  ;;  %v282_v4 = vpop.f32.mrf.mxu1 }
  0xc3   : > { %326 = vst [vmem:[%s755_s26 + $0x50] sm:$0xff] %v310_v1  ;;  %v242_v5 = vadd.f32 %v241_v3, %v747_v41  ;;  %v283_v6 = vadd.f32 %v282_v4, %v749_v42 }
  0xc4   : > { %327 = vst [vmem:[%s755_s26 + $0x58] sm:$0xff] %v311_v2 }
  0xc5   : > { %v304_v7 = vmax.f32 %v242_v5, 0.0  ;;  %v305_v8 = vmax.f32 %v283_v6, 0.0 }
  0xc6   : > { %v253_v9 = vpop.f32.mrf.mxu2  ;;  %v294_v10 = vpop.f32.mrf.mxu3 }
  0xc7   : > { %320 = vst [vmem:[%s755_s26 + $0x20] sm:$0xff] %v304_v7  ;;  %v254_v11 = vadd.f32 %v253_v9, %v747_v41  ;;  %v295_v12 = vadd.f32 %v294_v10, %v749_v42 }
  0xc8   : > { %321 = vst [vmem:[%s755_s26 + $0x28] sm:$0xff] %v305_v8 }
  0xc9   : > { %v312_v13 = vmax.f32 %v254_v11, 0.0  ;;  %v313_v14 = vmax.f32 %v295_v12, 0.0 }
  0xca   : > { %v244_v15 = vpop.f32.mrf.mxu0  ;;  %v285_v16 = vpop.f32.mrf.mxu1 }
  0xcb   : > { %328 = vst [vmem:[%s755_s26 + $0x60] sm:$0xff] %v312_v13  ;;  %v245_v17 = vadd.f32 %v244_v15, %v747_v41  ;;  %v286_v18 = vadd.f32 %v285_v16, %v749_v42 }
  0xcc   : > { %329 = vst [vmem:[%s755_s26 + $0x68] sm:$0xff] %v313_v14 }
  0xcd   : > { %v306_v19 = vmax.f32 %v245_v17, 0.0  ;;  %v307_v20 = vmax.f32 %v286_v18, 0.0 }
  0xce   : > { %v256_v21 = vpop.f32.mrf.mxu2  ;;  %v297_v22 = vpop.f32.mrf.mxu3 }
  0xcf   : > { %322 = vst [vmem:[%s755_s26 + $0x30] sm:$0xff] %v306_v19  ;;  %v257_v23 = vadd.f32 %v256_v21, %v747_v41  ;;  %v298_v24 = vadd.f32 %v297_v22, %v749_v42 }
  0xd0   : > { %323 = vst [vmem:[%s755_s26 + $0x38] sm:$0xff] %v307_v20 }
  0xd1   : > { %v314_v25 = vmax.f32 %v257_v23, 0.0  ;;  %v315_v26 = vmax.f32 %v298_v24, 0.0 }
  0xd3   : > { %330 = vst [vmem:[%s755_s26 + $0x70] sm:$0xff] %v314_v25 }
  0xd4   : > { %331 = vst [vmem:[%s755_s26 + $0x78] sm:$0xff] %v315_v26 }
  0xd5   : > { %526 = shalt.err (!%p523_p3)
}
  0xd6   : > { %s563_s19 = smov 256   ;;  %s564_s20 = smov 16  }
  0xd7   : > { %458 = dma.vmem_to_hbm [thread:$0]  (%p623_p5), %s347_s16, 2048, %s349_s4, %s333_s5, %s563_s19, %s563_s19, %s564_s20  }
  0xd8 PF: > { %p464_p4 = scmp.ge.s32.totalorder %s561_s15, 2  ;;  %s363_s24 = sand.u32 1, %s549_s12  }
  0xd9   : > { %s364_s25 = scalar_lea.sflag [#allocation3], %s363_s24 }
  0xda   : > { %p461_p7 = pnand %p464_p4, %p627_p6 }
  0xdc   : > { %p462_p8 = pneg %p461_p7 }
  0xde   : > { %544 = dma.done.wait (%p462_p8), %s364_s25, 2048  }
  0xdf   : > { %546 = vsyncadd (%p462_p8), %s364_s25, 4294965248  ;;  %p13_p9 = scmp.ge.s32.totalorder %s610_s18, 4   ;;  %s827_s12 = smov %s553_s13 }
  0xe0   : > { %s828_s13 = smov %s557_s14  ;;  %s829_s14 = smov %s621_s21 }
  0xe1   : > { %s830_s15 = smov %s610_s18  ;;  %15 = sbr.rel (!%p13_p9) target bundleno = 3 (0x3), region = 67 }
  0xe6   :  { %370 = vsyncpa [#allocation3], 1 }
  0xe7   :  { %372 = vsyncpa [#allocation3 + $0x1], 1 }

</bundles_post_ra>
